<compile_context>
chip_gen: v7x
topology: tpu7x:2x2x1
jax: 0.10.0
libtpu: 0.0.40
codegen_flags: <defaults>
</compile_context>

<pallas_src>
import jax
import jax.numpy as jnp
from jax.experimental import pallas as pl
from jax.experimental.pallas import tpu as pltpu


def _round_up(x: int, m: int) -> int:
    return ((x + m - 1) // m) * m


def _sigmoid(x):
    # sigmoid(x) = 0.5 * tanh(0.5 * x) + 0.5  ->  one EUP op + a VALU fma,
    # exact (unlike exp + approx reciprocal).
    return 0.5 * jnp.tanh(0.5 * x) + 0.5


def rbm_forward_kernel(v_ref, wt_ref, w_ref, hb_ref, vb_ref, vout_ref, hout_ref):
    v = v_ref[...]        # [TB, n_vis_p]      bf16 batch tile
    wt = wt_ref[...]      # [n_vis_p, n_hid_p] bf16 (pre-transposed W, resident)
    w = w_ref[...]        # [n_hid_p, n_vis_p] bf16 (resident)
    hb = hb_ref[...]      # [1, n_hid_p]       f32
    vb = vb_ref[...]      # [1, n_vis_p]       f32

    # h = sigmoid(v @ W.T + h_bias): bf16 MXU inputs, f32 accumulation.
    pre_h = jnp.dot(v, wt, preferred_element_type=jnp.float32) + hb
    h = _sigmoid(pre_h)                                     # [TB, n_hid_p] f32

    # v_out = sigmoid(h @ W + v_bias)
    pre_v = jnp.dot(h.astype(w.dtype), w,
                    preferred_element_type=jnp.float32) + vb
    v_out = _sigmoid(pre_v)                                 # [TB, n_vis_p] f32

    hout_ref[...] = h.astype(hout_ref.dtype)
    vout_ref[...] = v_out.astype(vout_ref.dtype)


def _vmem_budget_bytes() -> int:
    """~85% of per-core VMEM capacity; conservative fallback if query fails."""
    try:
        cap = int(pltpu.get_tpu_info().vmem_capacity_bytes)
    except Exception:
        cap = 64 << 20   # v7x per-TC capacity = the smallest across generations
    return int(cap * 0.85)


def prepare_rbm_params(W, h_bias, v_bias, *, compute_dtype=jnp.bfloat16):
    """One-time parameter prep: pad to lane/sublane alignment, transpose, cast.

    Hoisted out of forward() so the per-call path never re-reads / rewrites
    the full weight matrices in HBM.
    """
    n_hid, n_vis = W.shape
    n_vis_p = _round_up(n_vis, 128)
    n_hid_p = _round_up(n_hid, 128)
    f32 = jnp.float32

    # Zero padding keeps the math exact for the real units: padded hidden
    # columns of h evaluate to sigmoid(0)=0.5 but multiply all-zero rows of W,
    # and padded output columns are sliced off in forward().
    W_p = jnp.zeros((n_hid_p, n_vis_p), compute_dtype)
    W_p = W_p.at[:n_hid, :n_vis].set(W.astype(compute_dtype))
    WT_p = jnp.zeros((n_vis_p, n_hid_p), compute_dtype)
    WT_p = WT_p.at[:n_vis, :n_hid].set(W.T.astype(compute_dtype))
    hb_p = jnp.zeros((1, n_hid_p), f32).at[0, :n_hid].set(h_bias.astype(f32))
    vb_p = jnp.zeros((1, n_vis_p), f32).at[0, :n_vis].set(v_bias.astype(f32))

    return {
        "W_p": W_p, "WT_p": WT_p, "hb_p": hb_p, "vb_p": vb_p,
        "n_vis": n_vis, "n_hid": n_hid,
        "n_vis_p": n_vis_p, "n_hid_p": n_hid_p,
        "compute_dtype": compute_dtype,
    }


def _choose_batch_tile(B, n_vis_p, n_hid_p, w_itemsize, out_itemsize, budget,
                       *, max_tile=512, target_steps=4):
    """Batch tile: multiple of 8, aims for >= target_steps grid steps (pipeline
    depth + v7x megacore), capped by max_tile and the VMEM budget."""
    B8 = _round_up(max(B, 1), 8)
    TB = min(max_tile, max(8, _round_up(pl.cdiv(B8, target_steps), 8)))

    def footprint(tb):
        weights = 2 * 2 * n_hid_p * n_vis_p * w_itemsize    # W + W^T (worst case 2x buffered)
        biases = 2 * 2 * (n_hid_p + n_vis_p) * 4
        tiles = 2 * tb * (n_vis_p * w_itemsize              # v in  (double-buffered)
                          + n_vis_p * out_itemsize          # v_out (double-buffered)
                          + n_hid_p * out_itemsize)         # h     (double-buffered)
        return weights + biases + tiles

    while TB > 8 and footprint(TB) > budget:
        TB = max(8, _round_up(TB // 2, 8))
    return TB, footprint(TB)


def _build_specs(TB, n_vis_p, n_hid_p, single_buffer_consts):
    const_kw = {"pipeline_mode": pl.Buffered(1)} if single_buffer_consts else {}
    in_specs = [
        pl.BlockSpec((TB, n_vis_p), lambda i: (i, 0)),                    # v (batch-tiled)
        pl.BlockSpec((n_vis_p, n_hid_p), lambda i: (0, 0), **const_kw),   # W^T (resident)
        pl.BlockSpec((n_hid_p, n_vis_p), lambda i: (0, 0), **const_kw),   # W   (resident)
        pl.BlockSpec((1, n_hid_p), lambda i: (0, 0), **const_kw),         # h_bias
        pl.BlockSpec((1, n_vis_p), lambda i: (0, 0), **const_kw),         # v_bias
    ]
    out_specs = [
        pl.BlockSpec((TB, n_vis_p), lambda i: (i, 0)),                    # v_out
        pl.BlockSpec((TB, n_hid_p), lambda i: (i, 0)),                    # h
    ]
    return in_specs, out_specs


def rbm_forward(v, params, *, out_dtype=jnp.float32, max_batch_tile=512):
    """Pallas RBM forward.  v: [B, n_vis]; params from prepare_rbm_params()."""
    B = v.shape[0]
    n_vis, n_hid = params["n_vis"], params["n_hid"]
    n_vis_p, n_hid_p = params["n_vis_p"], params["n_hid_p"]
    cdt = params["compute_dtype"]
    w_itemsize = jnp.dtype(cdt).itemsize
    out_itemsize = jnp.dtype(out_dtype).itemsize

    budget = _vmem_budget_bytes()
    TB, footprint = _choose_batch_tile(
        B, n_vis_p, n_hid_p, w_itemsize, out_itemsize, budget,
        max_tile=max_batch_tile)
    B_p = _round_up(_round_up(B, 8), TB)
    grid = (B_p // TB,)
    vmem_limit = int(min(budget, max(footprint + (4 << 20), 16 << 20)))

    # Per-call activation padding/cast (weights were prepared once).
    if v.shape == (B_p, n_vis_p) and v.dtype == cdt:
        v_p = v
    else:
        v_p = jnp.zeros((B_p, n_vis_p), cdt).at[:B, :n_vis].set(v.astype(cdt))

    cost = pl.CostEstimate(
        flops=2 * 2 * B_p * n_vis_p * n_hid_p,               # two matmuls
        transcendentals=B_p * (n_vis_p + n_hid_p),           # one tanh / sigmoid elem
        bytes_accessed=int(
            w_itemsize * (B_p * n_vis_p + 2 * n_hid_p * n_vis_p)
            + out_itemsize * (B_p * n_vis_p + B_p * n_hid_p)
            + 4 * (n_hid_p + n_vis_p)),
    )

    out_shape = (
        jax.ShapeDtypeStruct((B_p, n_vis_p), out_dtype),     # v_out
        jax.ShapeDtypeStruct((B_p, n_hid_p), out_dtype),     # h
    )
    compiler_params = pltpu.CompilerParams(
        dimension_semantics=("parallel",),  # megacore shard on v7x; no-op v5e/v6e
        vmem_limit_bytes=vmem_limit,
    )

    def run(single_buffer_consts):
        in_specs, out_specs = _build_specs(TB, n_vis_p, n_hid_p,
                                           single_buffer_consts)
        return pl.pallas_call(
            rbm_forward_kernel,
            out_shape=out_shape,
            grid_spec=pltpu.PrefetchScalarGridSpec(
                num_scalar_prefetch=0,
                grid=grid,
                in_specs=in_specs,
                out_specs=out_specs,
            ),
            compiler_params=compiler_params,
            cost_estimate=cost,
        )(v_p, params["WT_p"], params["W_p"], params["hb_p"], params["vb_p"])

    try:
        v_out_p, h_p = run(single_buffer_consts=True)
    except Exception:
        # Fallback if this Pallas build rejects pipeline_mode=pl.Buffered(1).
        v_out_p, h_p = run(single_buffer_consts=False)

    return v_out_p[:B, :n_vis], h_p[:B, :n_hid]


def rbm_forward_ref(v, W, h_bias, v_bias):
    h = jax.nn.sigmoid(v @ W.T + h_bias)
    v_out = jax.nn.sigmoid(h @ W + v_bias)
    return v_out, h


if __name__ == "__main__":
    key = jax.random.PRNGKey(0)
    k_v, k_w = jax.random.split(key)

    B, n_vis, n_hid = 8, 256, 128

    # Deterministic parameter init mirroring the module's __init__:
    # W ~ N(0,1)*0.01, biases zero.
    W = jax.random.normal(k_w, (n_hid, n_vis), dtype=jnp.float32) * 0.01
    h_bias = jnp.zeros((n_hid,), dtype=jnp.float32)
    v_bias = jnp.zeros((n_vis,), dtype=jnp.float32)
    v_in = jax.random.uniform(k_v, (B, n_vis), dtype=jnp.float32)

    params = prepare_rbm_params(W, h_bias, v_bias)   # one-time weight prep
    v_out, h = rbm_forward(v_in, params)
    jax.block_until_ready((v_out, h))

    v_ref, h_ref = rbm_forward_ref(v_in, W, h_bias, v_bias)
    assert v_out.shape == (B, n_vis) and h.shape == (B, n_hid)
    # bf16 MXU inputs with f32 accumulation + exact tanh-form sigmoid.
    assert jnp.allclose(v_out, v_ref, atol=2e-3, rtol=2e-3)
    assert jnp.allclose(h, h_ref, atol=2e-3, rtol=2e-3)

    # TODO(synk): sample_h / sample_v / contrastive_divergence (Bernoulli
    # sampling + in-place parameter updates) are training utilities, not part
    # of forward().

    print("KERNEL_OK")
</pallas_src>

<mosaic_0001>
module attributes {stable_mosaic.version = 11 : i64} {
  func.func @rbm_forward_kernel(%arg0: i32, %arg1: memref<8x256xbf16, #tpu.memory_space<vmem>>, %arg2: memref<256x128xbf16, #tpu.memory_space<vmem>>, %arg3: memref<128x256xbf16, #tpu.memory_space<vmem>>, %arg4: memref<1x128xf32, #tpu.memory_space<vmem>>, %arg5: memref<1x256xf32, #tpu.memory_space<vmem>>, %arg6: memref<8x256xf32, #tpu.memory_space<vmem>>, %arg7: memref<8x128xf32, #tpu.memory_space<vmem>>) attributes {dimension_semantics = [#tpu.dimension_semantics<parallel>], iteration_bounds = array<i64: 1>, scalar_prefetch = 0 : i64, scratch_operands = 0 : i64, tpu.core_type = #tpu.core_type<tc>, window_params = [{transform_indices = @transform_0, window_bounds = array<i64: 8, 256>}, {pipeline_mode = #tpu.pipeline_mode<synchronous>, transform_indices = @transform_1, window_bounds = array<i64: 256, 128>}, {pipeline_mode = #tpu.pipeline_mode<synchronous>, transform_indices = @transform_2, window_bounds = array<i64: 128, 256>}, {pipeline_mode = #tpu.pipeline_mode<synchronous>, transform_indices = @transform_3, window_bounds = array<i64: 1, 128>}, {pipeline_mode = #tpu.pipeline_mode<synchronous>, transform_indices = @transform_4, window_bounds = array<i64: 1, 256>}, {transform_indices = @transform_5, window_bounds = array<i64: 8, 256>}, {transform_indices = @transform_6, window_bounds = array<i64: 8, 128>}]} {
    %c0 = arith.constant 0 : index
    %c0_0 = arith.constant 0 : index
    %0 = vector.load %arg1[%c0, %c0_0] : memref<8x256xbf16, #tpu.memory_space<vmem>>, vector<8x256xbf16>
    %c0_1 = arith.constant 0 : index
    %c0_2 = arith.constant 0 : index
    %1 = vector.load %arg2[%c0_1, %c0_2] : memref<256x128xbf16, #tpu.memory_space<vmem>>, vector<256x128xbf16>
    %c0_3 = arith.constant 0 : index
    %c0_4 = arith.constant 0 : index
    %2 = vector.load %arg3[%c0_3, %c0_4] : memref<128x256xbf16, #tpu.memory_space<vmem>>, vector<128x256xbf16>
    %c0_5 = arith.constant 0 : index
    %c0_6 = arith.constant 0 : index
    %3 = vector.load %arg4[%c0_5, %c0_6] : memref<1x128xf32, #tpu.memory_space<vmem>>, vector<1x128xf32>
    %c0_7 = arith.constant 0 : index
    %c0_8 = arith.constant 0 : index
    %4 = vector.load %arg5[%c0_7, %c0_8] : memref<1x256xf32, #tpu.memory_space<vmem>>, vector<1x256xf32>
    %cst = arith.constant dense<0.000000e+00> : vector<8x128xf32>
    %5 = tpu.matmul %0, %1, %cst {dimension_numbers = #tpu.dot_dimension_numbers<[1], [0], [0], [1], [0, 0, 1, 1], [], []>} : vector<8x256xbf16>, vector<256x128xbf16>, vector<8x128xf32> -> vector<8x128xf32>
    %6 = vector.broadcast %3 : vector<1x128xf32> to vector<8x128xf32>
    %7 = arith.addf %5, %6 : vector<8x128xf32>
    %cst_9 = arith.constant 5.000000e-01 : f32
    %8 = vector.broadcast %cst_9 : f32 to vector<8x128xf32>
    %9 = arith.mulf %8, %7 : vector<8x128xf32>
    %10 = math.tanh %9 : vector<8x128xf32>
    %cst_10 = arith.constant 5.000000e-01 : f32
    %11 = vector.broadcast %cst_10 : f32 to vector<8x128xf32>
    %12 = arith.mulf %11, %10 : vector<8x128xf32>
    %cst_11 = arith.constant 5.000000e-01 : f32
    %13 = vector.broadcast %cst_11 : f32 to vector<8x128xf32>
    %14 = arith.addf %12, %13 : vector<8x128xf32>
    %15 = arith.truncf %14 : vector<8x128xf32> to vector<8x128xbf16>
    %cst_12 = arith.constant dense<0.000000e+00> : vector<8x256xf32>
    %16 = tpu.matmul %15, %2, %cst_12 {dimension_numbers = #tpu.dot_dimension_numbers<[1], [0], [0], [1], [0, 0, 1, 1], [], []>} : vector<8x128xbf16>, vector<128x256xbf16>, vector<8x256xf32> -> vector<8x256xf32>
    %17 = vector.broadcast %4 : vector<1x256xf32> to vector<8x256xf32>
    %18 = arith.addf %16, %17 : vector<8x256xf32>
    %cst_13 = arith.constant 5.000000e-01 : f32
    %19 = vector.broadcast %cst_13 : f32 to vector<8x256xf32>
    %20 = arith.mulf %19, %18 : vector<8x256xf32>
    %21 = math.tanh %20 : vector<8x256xf32>
    %cst_14 = arith.constant 5.000000e-01 : f32
    %22 = vector.broadcast %cst_14 : f32 to vector<8x256xf32>
    %23 = arith.mulf %22, %21 : vector<8x256xf32>
    %cst_15 = arith.constant 5.000000e-01 : f32
    %24 = vector.broadcast %cst_15 : f32 to vector<8x256xf32>
    %25 = arith.addf %23, %24 : vector<8x256xf32>
    %c0_16 = arith.constant 0 : index
    %c0_17 = arith.constant 0 : index
    %26 = vector.load %arg7[%c0_16, %c0_17] : memref<8x128xf32, #tpu.memory_space<vmem>>, vector<8x128xf32>
    tpu.vector_store %arg7[%c0_16, %c0_17], %14 {strides = array<i32>} : memref<8x128xf32, #tpu.memory_space<vmem>>, vector<8x128xf32>,
    %c0_18 = arith.constant 0 : index
    %c0_19 = arith.constant 0 : index
    %27 = vector.load %arg6[%c0_18, %c0_19] : memref<8x256xf32, #tpu.memory_space<vmem>>, vector<8x256xf32>
    tpu.vector_store %arg6[%c0_18, %c0_19], %25 {strides = array<i32>} : memref<8x256xf32, #tpu.memory_space<vmem>>, vector<8x256xf32>,
    return
  }
  func.func @transform_0(%arg0: i32) -> (i32, i32) {
    %c0_i32 = arith.constant 0 : i32
    %c0_i32_0 = arith.constant 0 : i32
    return %arg0, %c0_i32 : i32, i32
  }
  func.func @transform_1(%arg0: i32) -> (i32, i32) {
    %c0_i32 = arith.constant 0 : i32
    %c0_i32_0 = arith.constant 0 : i32
    %c0_i32_1 = arith.constant 0 : i32
    return %c0_i32, %c0_i32_0 : i32, i32
  }
  func.func @transform_2(%arg0: i32) -> (i32, i32) {
    %c0_i32 = arith.constant 0 : i32
    %c0_i32_0 = arith.constant 0 : i32
    %c0_i32_1 = arith.constant 0 : i32
    return %c0_i32, %c0_i32_0 : i32, i32
  }
  func.func @transform_3(%arg0: i32) -> (i32, i32) {
    %c0_i32 = arith.constant 0 : i32
    %c0_i32_0 = arith.constant 0 : i32
    %c0_i32_1 = arith.constant 0 : i32
    return %c0_i32, %c0_i32_0 : i32, i32
  }
  func.func @transform_4(%arg0: i32) -> (i32, i32) {
    %c0_i32 = arith.constant 0 : i32
    %c0_i32_0 = arith.constant 0 : i32
    %c0_i32_1 = arith.constant 0 : i32
    return %c0_i32, %c0_i32_0 : i32, i32
  }
  func.func @transform_5(%arg0: i32) -> (i32, i32) {
    %c0_i32 = arith.constant 0 : i32
    %c0_i32_0 = arith.constant 0 : i32
    return %arg0, %c0_i32 : i32, i32
  }
  func.func @transform_6(%arg0: i32) -> (i32, i32) {
    %c0_i32 = arith.constant 0 : i32
    %c0_i32_0 = arith.constant 0 : i32
    return %arg0, %c0_i32 : i32, i32
  }
}

module attributes {stable_mosaic.version = 11 : i64} {
  func.func @rbm_forward_kernel(%arg0: i32, %arg1: memref<8x256xbf16, #tpu.memory_space<vmem>>, %arg2: memref<256x128xbf16, #tpu.memory_space<vmem>>, %arg3: memref<128x256xbf16, #tpu.memory_space<vmem>>, %arg4: memref<1x128xf32, #tpu.memory_space<vmem>>, %arg5: memref<1x256xf32, #tpu.memory_space<vmem>>, %arg6: memref<8x256xf32, #tpu.memory_space<vmem>>, %arg7: memref<8x128xf32, #tpu.memory_space<vmem>>) attributes {dimension_semantics = [#tpu.dimension_semantics<parallel>], iteration_bounds = array<i64: 1>, scalar_prefetch = 0 : i64, scratch_operands = 0 : i64, tpu.core_type = #tpu.core_type<tc>, window_params = [{transform_indices = @transform_0, window_bounds = array<i64: 8, 256>}, {pipeline_mode = #tpu.pipeline_mode<synchronous>, transform_indices = @transform_1, window_bounds = array<i64: 256, 128>}, {pipeline_mode = #tpu.pipeline_mode<synchronous>, transform_indices = @transform_2, window_bounds = array<i64: 128, 256>}, {pipeline_mode = #tpu.pipeline_mode<synchronous>, transform_indices = @transform_3, window_bounds = array<i64: 1, 128>}, {pipeline_mode = #tpu.pipeline_mode<synchronous>, transform_indices = @transform_4, window_bounds = array<i64: 1, 256>}, {transform_indices = @transform_5, window_bounds = array<i64: 8, 256>}, {transform_indices = @transform_6, window_bounds = array<i64: 8, 128>}]} {
    %c0 = arith.constant 0 : index
    %c0_0 = arith.constant 0 : index
    %0 = vector.load %arg1[%c0, %c0_0] : memref<8x256xbf16, #tpu.memory_space<vmem>>, vector<8x256xbf16>
    %c0_1 = arith.constant 0 : index
    %c0_2 = arith.constant 0 : index
    %1 = vector.load %arg2[%c0_1, %c0_2] : memref<256x128xbf16, #tpu.memory_space<vmem>>, vector<256x128xbf16>
    %c0_3 = arith.constant 0 : index
    %c0_4 = arith.constant 0 : index
    %2 = vector.load %arg3[%c0_3, %c0_4] : memref<128x256xbf16, #tpu.memory_space<vmem>>, vector<128x256xbf16>
    %c0_5 = arith.constant 0 : index
    %c0_6 = arith.constant 0 : index
    %3 = vector.load %arg4[%c0_5, %c0_6] : memref<1x128xf32, #tpu.memory_space<vmem>>, vector<1x128xf32>
    %c0_7 = arith.constant 0 : index
    %c0_8 = arith.constant 0 : index
    %4 = vector.load %arg5[%c0_7, %c0_8] : memref<1x256xf32, #tpu.memory_space<vmem>>, vector<1x256xf32>
    %cst = arith.constant dense<0.000000e+00> : vector<8x128xf32>
    %5 = tpu.matmul %0, %1, %cst {dimension_numbers = #tpu.dot_dimension_numbers<[1], [0], [0], [1], [0, 0, 1, 1], [], []>} : vector<8x256xbf16>, vector<256x128xbf16>, vector<8x128xf32> -> vector<8x128xf32>
    %6 = vector.broadcast %3 : vector<1x128xf32> to vector<8x128xf32>
    %7 = arith.addf %5, %6 : vector<8x128xf32>
    %cst_9 = arith.constant 5.000000e-01 : f32
    %8 = vector.broadcast %cst_9 : f32 to vector<8x128xf32>
    %9 = arith.mulf %8, %7 : vector<8x128xf32>
    %10 = math.tanh %9 : vector<8x128xf32>
    %cst_10 = arith.constant 5.000000e-01 : f32
    %11 = vector.broadcast %cst_10 : f32 to vector<8x128xf32>
    %12 = arith.mulf %11, %10 : vector<8x128xf32>
    %cst_11 = arith.constant 5.000000e-01 : f32
    %13 = vector.broadcast %cst_11 : f32 to vector<8x128xf32>
    %14 = arith.addf %12, %13 : vector<8x128xf32>
    %15 = arith.truncf %14 : vector<8x128xf32> to vector<8x128xbf16>
    %cst_12 = arith.constant dense<0.000000e+00> : vector<8x256xf32>
    %16 = tpu.matmul %15, %2, %cst_12 {dimension_numbers = #tpu.dot_dimension_numbers<[1], [0], [0], [1], [0, 0, 1, 1], [], []>} : vector<8x128xbf16>, vector<128x256xbf16>, vector<8x256xf32> -> vector<8x256xf32>
    %17 = vector.broadcast %4 : vector<1x256xf32> to vector<8x256xf32>
    %18 = arith.addf %16, %17 : vector<8x256xf32>
    %cst_13 = arith.constant 5.000000e-01 : f32
    %19 = vector.broadcast %cst_13 : f32 to vector<8x256xf32>
    %20 = arith.mulf %19, %18 : vector<8x256xf32>
    %21 = math.tanh %20 : vector<8x256xf32>
    %cst_14 = arith.constant 5.000000e-01 : f32
    %22 = vector.broadcast %cst_14 : f32 to vector<8x256xf32>
    %23 = arith.mulf %22, %21 : vector<8x256xf32>
    %cst_15 = arith.constant 5.000000e-01 : f32
    %24 = vector.broadcast %cst_15 : f32 to vector<8x256xf32>
    %25 = arith.addf %23, %24 : vector<8x256xf32>
    %c0_16 = arith.constant 0 : index
    %c0_17 = arith.constant 0 : index
    %26 = vector.load %arg7[%c0_16, %c0_17] : memref<8x128xf32, #tpu.memory_space<vmem>>, vector<8x128xf32>
    tpu.vector_store %arg7[%c0_16, %c0_17], %14 {strides = array<i32>} : memref<8x128xf32, #tpu.memory_space<vmem>>, vector<8x128xf32>,
    %c0_18 = arith.constant 0 : index
    %c0_19 = arith.constant 0 : index
    %27 = vector.load %arg6[%c0_18, %c0_19] : memref<8x256xf32, #tpu.memory_space<vmem>>, vector<8x256xf32>
    tpu.vector_store %arg6[%c0_18, %c0_19], %25 {strides = array<i32>} : memref<8x256xf32, #tpu.memory_space<vmem>>, vector<8x256xf32>,
    return
  }
  func.func @transform_0(%arg0: i32) -> (i32, i32) {
    %c0_i32 = arith.constant 0 : i32
    %c0_i32_0 = arith.constant 0 : i32
    return %arg0, %c0_i32 : i32, i32
  }
  func.func @transform_1(%arg0: i32) -> (i32, i32) {
    %c0_i32 = arith.constant 0 : i32
    %c0_i32_0 = arith.constant 0 : i32
    %c0_i32_1 = arith.constant 0 : i32
    return %c0_i32, %c0_i32_0 : i32, i32
  }
  func.func @transform_2(%arg0: i32) -> (i32, i32) {
    %c0_i32 = arith.constant 0 : i32
    %c0_i32_0 = arith.constant 0 : i32
    %c0_i32_1 = arith.constant 0 : i32
    return %c0_i32, %c0_i32_0 : i32, i32
  }
  func.func @transform_3(%arg0: i32) -> (i32, i32) {
    %c0_i32 = arith.constant 0 : i32
    %c0_i32_0 = arith.constant 0 : i32
    %c0_i32_1 = arith.constant 0 : i32
    return %c0_i32, %c0_i32_0 : i32, i32
  }
  func.func @transform_4(%arg0: i32) -> (i32, i32) {
    %c0_i32 = arith.constant 0 : i32
    %c0_i32_0 = arith.constant 0 : i32
    %c0_i32_1 = arith.constant 0 : i32
    return %c0_i32, %c0_i32_0 : i32, i32
  }
  func.func @transform_5(%arg0: i32) -> (i32, i32) {
    %c0_i32 = arith.constant 0 : i32
    %c0_i32_0 = arith.constant 0 : i32
    return %arg0, %c0_i32 : i32, i32
  }
  func.func @transform_6(%arg0: i32) -> (i32, i32) {
    %c0_i32 = arith.constant 0 : i32
    %c0_i32_0 = arith.constant 0 : i32
    return %arg0, %c0_i32 : i32, i32
  }
}

</mosaic_0001>

<bundles_post_ra>
// kernel: tpu_custom_call.1
= control target key start
LH: loop header
LB: loop body
LE: loop exit
PB: predicated region body
PF: predicated region fallthrough
CT: control target
= control target key end

     0   :  { %12 = vsyncpa [#allocation3], 0  ;;  %s786_s0 = inlined_call_operand.hbm [shape: bf16[8,256], index: 0, kind: input, shape index: {}]   ;;  %s787_s1 = inlined_call_operand.hbm [shape: bf16[256,128], index: 1, kind: input, shape index: {}]   ;;  %s788_s2 = inlined_call_operand.hbm [shape: bf16[128,256], index: 2, kind: input, shape index: {}]   ;;  %s789_s3 = inlined_call_operand.vmem [shape: f32[1,128], index: 3, kind: input, shape index: {}]   ;;  %s790_s4 = inlined_call_operand.vmem [shape: f32[1,256], index: 4, kind: input, shape index: {}]   ;;  %s791_s5 = inlined_call_operand.hbm [shape: f32[8,256], index: 5, kind: output, shape index: {0}]   ;;  %s792_s6 = inlined_call_operand.hbm [shape: f32[8,128], index: 6, kind: output, shape index: {1}]  }
   0x1   :  { %13 = vsyncpa [#allocation6], 0 }
   0x2   :  { %14 = vsyncpa [#allocation4], 0 }
   0x3   :  { %15 = vsyncpa [#allocation10], 0  ;;  %s675_s21 = smov [#allocation5]   ;;  %s557_s25 = scalar_lea.hbm %s787_s1, 2048 }
   0x4   :  { %s31_s22 = sshll.u32 %s675_s21, 4  ;;  %p558_p0 = scmp.ne.s32.totalorder %s787_s1, %s557_s25  ;;  %s32_s22 = int_to_ptr.vmem [resolvable:$true] %s31_s22 }
   0x5   :  { %p561_p1 = scmp.lt.u32.totalorder %s557_s25, %s787_s1 }
   0x7   :  { %p563_p2 = pnand %p561_p1, %p558_p0 }
   0x9   :  { %566 = shalt.err (!%p563_p2)
}
   0xa   :  { %s567_s30 = scalar_lea.vmem %s32_s22, 2048  ;;  %p572_p4 = scmp.lt.s32.totalorder %s32_s22, %s32_s22 }
   0xb   :  { %p568_p3 = scmp.ne.s32.totalorder %s32_s22, %s567_s30  ;;  %p573_p5 = scmp.lt.s32.totalorder %s567_s30, %s567_s30 }
   0xd   :  { %p574_p6 = por %p573_p5, %p572_p4 }
   0xf   :  { %p575_p7 = pnand %p574_p6, %p568_p3 }
  0x11   :  { %578 = shalt.err (!%p575_p7)
}
  0x12   :  { %s676_s7 = smov 64   ;;  %s677_s8 = smov 4  }
  0x13   :  { %37 = dma.hbm_to_vmem [thread:$0]  %s787_s1, 2048, %s32_s22, [#allocation6], %s676_s7, %s676_s7, %s677_s8  }
  0x14   :  { %s678_s11 = smov [#allocation2]   ;;  %s679_s13 = smov [#allocation7]  }
  0x15   :  { %s22_s12 = sshll.u32 %s678_s11, 4  ;;  %s43_s14 = sshll.u32 %s679_s13, 4  ;;  %s23_s12 = int_to_ptr.vmem [resolvable:$true] %s22_s12  ;;  %s44_s14 = int_to_ptr.vmem [resolvable:$true] %s43_s14 }
  0x16   :  { %s579_s17 = scalar_lea.hbm %s786_s0, 128 }
  0x17   :  { %p580_p8 = scmp.ne.s32.totalorder %s786_s0, %s579_s17  ;;  %p583_p9 = scmp.lt.u32.totalorder %s579_s17, %s786_s0 }
  0x19   :  { %p585_p10 = pnand %p583_p9, %p580_p8 }
  0x1b   :  { %588 = shalt.err (!%p585_p10)
}
  0x1c   :  { %s589_s1 = scalar_lea.vmem %s23_s12, 128  ;;  %p594_p12 = scmp.lt.s32.totalorder %s23_s12, %s23_s12 }
  0x1d   :  { %p590_p11 = scmp.ne.s32.totalorder %s23_s12, %s589_s1  ;;  %p595_p13 = scmp.lt.s32.totalorder %s589_s1, %s589_s1 }
  0x1f   :  { %p596_p0 = por %p595_p13, %p594_p12 }
  0x21   :  { %p597_p1 = pnand %p596_p0, %p590_p11 }
  0x23   :  { %600 = shalt.err (!%p597_p1)
}
  0x24   :  { %25 = dma.hbm_to_vmem [thread:$0]  %s786_s0, 128, %s23_s12, [#allocation3]  }
  0x25   :  { %s601_s26 = scalar_lea.hbm %s788_s2, 2048 }
  0x26   :  { %p602_p2 = scmp.ne.s32.totalorder %s788_s2, %s601_s26  ;;  %p605_p3 = scmp.lt.u32.totalorder %s601_s26, %s788_s2 }
  0x28   :  { %p607_p4 = pnand %p605_p3, %p602_p2 }
  0x2a   :  { %610 = shalt.err (!%p607_p4)
}
  0x2b   :  { %s611_s7 = scalar_lea.vmem %s44_s14, 2048  ;;  %p616_p6 = scmp.lt.s32.totalorder %s44_s14, %s44_s14 }
  0x2c   :  { %p612_p5 = scmp.ne.s32.totalorder %s44_s14, %s611_s7  ;;  %p617_p7 = scmp.lt.s32.totalorder %s611_s7, %s611_s7 }
  0x2e   :  { %p618_p8 = por %p617_p7, %p616_p6 }
  0x30   :  { %p619_p9 = pnand %p618_p8, %p612_p5 }
  0x32   :  { %622 = shalt.err (!%p619_p9)
}
  0x33   :  { %s680_s0 = smov 128   ;;  %s681_s8 = smov 8  }
  0x34   :  { %49 = dma.hbm_to_vmem [thread:$0]  %s788_s2, 2048, %s44_s14, [#allocation6], %s680_s0, %s680_s0, %s681_s8  }
  0x35   :  { %667 = dma.done.wait [#allocation3], 128  }
  0x36   :  { %668 = vsyncadd [#allocation3], 4294967168 }
  0x37   :  { %669 = dma.done.wait [#allocation6], 4096  }
  0x38   :  { %670 = vsyncadd [#allocation6], 4294963200  ;;  %v509_v0 = vld [vmem:[#allocation5 + $0x40] sm:$0xff]   ;;  %v511_v2 = vld [vmem:[#allocation5 + $0x48] sm:$0xff]   ;;  %v682_v35 = vmov 0   ;;  %s683_s12 = smov [#allocation9]  }
  0x39   :  { %v510_v1 = vld [vmem:[#allocation5] sm:$0xff]   ;;  %477 = vmatprep.subr.bf16.mxu0 %v509_v0  ;;  %v512_v3 = vld [vmem:[#allocation5 + $0x8] sm:$0xff]   ;;  %v513_v4 = vld [vmem:[#allocation5 + $0x50] sm:$0xff]   ;;  %392 = vmatprep.mubr.bf16.mxu1 %v682_v35  ;;  %s428_s13 = sshll.u32 %s683_s12, 4  ;;  %s429_s13 = int_to_ptr.vmem [resolvable:$true] %s428_s13 }
  0x3a   :  { %478 = vmatpush3.bf16.msra.mxu0 %v510_v1  ;;  %v514_v5 = vld [vmem:[#allocation5 + $0x10] sm:$0xff]   ;;  %v515_v6 = vld [vmem:[#allocation5 + $0x58] sm:$0xff]   ;;  %v517_v8 = vld [vmem:[#allocation5 + $0x60] sm:$0xff]   ;;  %s623_s14 = scalar_lea.vmem %s429_s13, 128  ;;  %p628_p11 = scmp.lt.s32.totalorder %s429_s13, %s429_s13 }
  0x3b   :  { %479 = vmatprep.subr.bf16.mxu0 %v511_v2  ;;  %v516_v7 = vld [vmem:[#allocation5 + $0x18] sm:$0xff]   ;;  %v518_v9 = vld [vmem:[#allocation5 + $0x20] sm:$0xff]   ;;  %v519_v10 = vld [vmem:[#allocation5 + $0x68] sm:$0xff]   ;;  %p624_p10 = scmp.ne.s32.totalorder %s429_s13, %s623_s14  ;;  %p629_p12 = scmp.lt.s32.totalorder %s623_s14, %s623_s14 }
  0x3c   :  { %v64_v11 = vld [vmem:[#allocation2] sm:$0xff]  ;;  %v520_v12 = vld [vmem:[#allocation5 + $0x28] sm:$0xff]   ;;  %v521_v16 = vld [vmem:[#allocation5 + $0x70] sm:$0xff]  }
  0x3d   :  { %v444_v13 = vcombine.high %v64_v11, %v64_v11  ;;  %v527_v14 = vld [vmem:[#allocation7 + $0x4] ss:$8 sps:$4 sm:$0xff]   ;;  %v529_v15 = vld [vmem:[#allocation7] ss:$8 sps:$4 sm:$0xff]   ;;  %v530_v17 = vld [vmem:[#allocation7 + $0x14] ss:$8 sps:$4 sm:$0xff]   ;;  %v443_v22 = vcombine.low %v64_v11, %v64_v11  ;;  %p630_p13 = por %p629_p12, %p628_p11 }
  0x3e   :  { %480 = vmatpush3.bf16.msra.mxu0 %v512_v3  ;;  %v532_v18 = vld [vmem:[#allocation7 + $0x10] ss:$8 sps:$4 sm:$0xff]   ;;  %360 = vmatprep.subr.bf16.mxu1 %v527_v14  ;;  %v533_v23 = vld [vmem:[#allocation7 + $0x24] ss:$8 sps:$4 sm:$0xff]   ;;  %v535_v24 = vld [vmem:[#allocation7 + $0x20] ss:$8 sps:$4 sm:$0xff]  }
  0x3f   :  { %481 = vmatprep.subr.bf16.mxu0 %v513_v4  ;;  %256 = vmatprep.mubr.bf16.mxu0 %v444_v13  ;;  %v522_v19 = vld [vmem:[#allocation5 + $0x30] sm:$0xff]   ;;  %v523_v20 = vld [vmem:[#allocation5 + $0x78] sm:$0xff]   ;;  %v539_v27 = vld [vmem:[#allocation7 + $0x44] ss:$8 sps:$4 sm:$0xff]   ;;  %p631_p0 = pnand %p630_p13, %p624_p10 }
  0x40   :  { %361 = vmatpush1.bf16.msra.mxu1 %v529_v15  ;;  %v524_v21 = vld [vmem:[#allocation5 + $0x38] sm:$0xff]   ;;  %v541_v28 = vld [vmem:[#allocation7 + $0x40] ss:$8 sps:$4 sm:$0xff]   ;;  %v545_v31 = vld [vmem:[#allocation7 + $0x64] ss:$8 sps:$4 sm:$0xff]  }
  0x41   :  { %362 = vmatprep.subr.bf16.mxu1 %v530_v17  ;;  %v536_v25 = vld [vmem:[#allocation7 + $0x34] ss:$8 sps:$4 sm:$0xff]   ;;  %v538_v26 = vld [vmem:[#allocation7 + $0x30] ss:$8 sps:$4 sm:$0xff]   ;;  %v547_v32 = vld [vmem:[#allocation7 + $0x60] ss:$8 sps:$4 sm:$0xff]  }
  0x42   :  { %482 = vmatpush3.bf16.msra.mxu0 %v514_v5  ;;  %v542_v29 = vld [vmem:[#allocation7 + $0x54] ss:$8 sps:$4 sm:$0xff]   ;;  %v544_v30 = vld [vmem:[#allocation7 + $0x50] ss:$8 sps:$4 sm:$0xff]  }
  0x43   :  { %483 = vmatprep.subr.bf16.mxu0 %v515_v6  ;;  %v548_v33 = vld [vmem:[#allocation7 + $0x74] ss:$8 sps:$4 sm:$0xff]   ;;  %v550_v34 = vld [vmem:[#allocation7 + $0x70] ss:$8 sps:$4 sm:$0xff]  }
  0x44   :  { %363 = vmatpush1.bf16.msra.mxu1 %v532_v18  ;;  %v442_v37 = vld [vmem:[%s789_s3] ss:$0 sm:$0xff] }
  0x45   :  { %364 = vmatprep.subr.bf16.mxu1 %v533_v23 }
  0x46   :  { %484 = vmatpush3.bf16.msra.mxu0 %v516_v7 }
  0x47   :  { %485 = vmatprep.subr.bf16.mxu0 %v517_v8 }
  0x48   :  { %365 = vmatpush1.bf16.msra.mxu1 %v535_v24 }
  0x49   :  { %366 = vmatprep.subr.bf16.mxu1 %v536_v25 }
  0x4a   :  { %486 = vmatpush3.bf16.msra.mxu0 %v518_v9 }
  0x4b   :  { %487 = vmatprep.subr.bf16.mxu0 %v519_v10 }
  0x4c   :  { %367 = vmatpush1.bf16.msra.mxu1 %v538_v26 }
  0x4d   :  { %368 = vmatprep.subr.bf16.mxu1 %v539_v27 }
  0x4e   :  { %488 = vmatpush3.bf16.msra.mxu0 %v520_v12 }
  0x4f   :  { %489 = vmatprep.subr.bf16.mxu0 %v521_v16 }
  0x50   :  { %369 = vmatpush1.bf16.msra.mxu1 %v541_v28 }
  0x51   :  { %370 = vmatprep.subr.bf16.mxu1 %v542_v29 }
  0x52   :  { %490 = vmatpush3.bf16.msra.mxu0 %v522_v19 }
  0x53   :  { %491 = vmatprep.subr.bf16.mxu0 %v523_v20 }
  0x54   :  { %371 = vmatpush1.bf16.msra.mxu1 %v544_v30 }
  0x55   :  { %372 = vmatprep.subr.bf16.mxu1 %v545_v31 }
  0x56   :  { %492 = vmatpush3.bf16.msra.mxu0 %v524_v21 }
  0x58   :  { %373 = vmatpush1.bf16.msra.mxu1 %v547_v32 }
  0x59   :  { %257 = vmatmul.mubr.bf16.vlgmr.msra.gmra.mrb[0].mxu0 %v443_v22  ;;  %374 = vmatprep.subr.bf16.mxu1 %v548_v33 }
  0x5c   :  { %375 = vmatpush1.bf16.msra.mxu1 %v550_v34 }
 0x12c   :  { %v493_v36 = vpop.f32.mrb[0].mxu0 }
 0x12d   :  { %v494_v38 = vpop.f32.mrb[1].mxu0 }
 0x12e   :  { %v495_v39 = vadd.f32 %v494_v38, %v493_v36  ;;  %v496_v40 = vpop.f32.mrb[2].mxu0 }
 0x12f   :  { %v497_v41 = vpop.f32.mrb[3].mxu0 }
 0x130   :  { %v259_v42 = vadd.f32 %v495_v39, %v442_v37 }
 0x132   :  { %v264_v43 = vmul.f32 0.5, %v259_v42 }
 0x134   :  { %551 = vtanh.f32 %v264_v43 }
 0x13e   :  { %v552_v44 = vpop.eup %551 }
 0x13f   :  { %v266_v45 = vmul.f32 0.5, %v552_v44 }
 0x141   :  { %v267_v46 = vadd.f32 0.5, %v266_v45 }
 0x143   :  { %v268_v47 = vpack.c.bf16 %v267_v46, %v267_v46  ;;  %409 = vst [vmem:[#allocation9] sm:$0xff] %v267_v46 }
 0x145   :  { %393 = vmatmul.mubr.bf16.vlgmr.msra.gmra.mrb[0].mxu1 %v268_v47 }
 0x146   :  { %634 = shalt.err (!%p631_p0)
}
 0x147   :  { %s635_s16 = scalar_lea.hbm %s792_s6, 128 }
 0x148   :  { %p636_p1 = scmp.ne.s32.totalorder %s792_s6, %s635_s16  ;;  %p639_p2 = scmp.lt.u32.totalorder %s635_s16, %s792_s6 }
 0x14a   :  { %p641_p3 = pnand %p639_p2, %p636_p1 }
 0x14c   :  { %644 = shalt.err (!%p641_p3)
}
 0x14d   :  { %431 = dma.vmem_to_hbm [thread:$0]  %s429_s13, 128, %s792_s6, [#allocation10]   ;;  %v270_v48 = vlaneseq  ;;  %v114_v51 = vld [vmem:[%s790_s4] sm:$0x3] }
 0x14e   :  { %s684_s6 = smov [#allocation8]  }
 0x14f   :  { %v271_v49 = vshrl.u32 %v270_v48, 7  ;;  %s418_s24 = sshll.u32 %s684_s6, 4  ;;  %s419_s24 = int_to_ptr.vmem [resolvable:$true] %s418_s24 }
 0x150   :  { %s645_s4 = scalar_lea.vmem %s419_s24, 256  ;;  %p650_p5 = scmp.lt.s32.totalorder %s419_s24, %s419_s24 }
 0x151   :  { %v272_v50 = vsub.s32 0, %v271_v49  ;;  %v276_v52 = vsub.s32 1, %v271_v49  ;;  %p646_p4 = scmp.ne.s32.totalorder %s419_s24, %s645_s4  ;;  %p651_p6 = scmp.lt.s32.totalorder %s645_s4, %s645_s4 }
 0x153   :  { %v273_v53 = vrot.slane %v114_v51, %v272_v50  ;;  %v277_v54 = vrot.slane %v114_v51, %v276_v52  ;;  %p652_p7 = por %p651_p6, %p650_p5 }
 0x155   :  { %p653_p8 = pnand %p652_p7, %p646_p4 }
 0x218   :  { %v394_v55 = vpop.f32.mrb[0].mxu1 }
 0x219   :  { %v395_v56 = vadd.f32 %v394_v55, %v273_v53  ;;  %v396_v57 = vpop.f32.mrb[1].mxu1 }
 0x21a   :  { %v397_v58 = vadd.f32 %v396_v57, %v277_v54  ;;  %v398_v59 = vpop.f32.mrb[2].mxu1 }
 0x21b   :  { %v401_v60 = vmul.f32 0.5, %v395_v56  ;;  %v399_v61 = vpop.f32.mrb[3].mxu1 }
 0x21c   :  { %v402_v62 = vmul.f32 0.5, %v397_v58 }
 0x21d   :  { %553 = vtanh.f32 %v401_v60 }
 0x21e   :  { %555 = vtanh.f32 %v402_v62 }
 0x227   :  { %v554_v63 = vpop.eup %553 }
 0x228   :  { %v556_v0 = vpop.eup %555  ;;  %v405_v1 = vmul.f32 0.5, %v554_v63 }
 0x229   :  { %v406_v2 = vmul.f32 0.5, %v556_v0 }
 0x22a   :  { %v407_v3 = vadd.f32 0.5, %v405_v1 }
 0x22b   :  { %v408_v4 = vadd.f32 0.5, %v406_v2 }
 0x22c   :  { %410 = vst [vmem:[#allocation8] sm:$0xff] %v407_v3 }
 0x22d   :  { %411 = vst [vmem:[#allocation8 + $0x8] sm:$0xff] %v408_v4 }
 0x22e   :  { %656 = shalt.err (!%p653_p8)
}
 0x22f   :  { %s657_s27 = scalar_lea.hbm %s791_s5, 256 }
 0x230   :  { %p658_p9 = scmp.ne.s32.totalorder %s791_s5, %s657_s27  ;;  %p661_p10 = scmp.lt.u32.totalorder %s657_s27, %s791_s5 }
 0x232   :  { %p663_p11 = pnand %p661_p10, %p658_p9 }
 0x234   :  { %666 = shalt.err (!%p663_p11)
}
 0x235   :  { %421 = dma.vmem_to_hbm [thread:$0]  %s419_s24, 256, %s791_s5, [#allocation4]  }
 0x236   :  { %671 = dma.done.wait [#allocation4], 256  }
 0x237   :  { %672 = vsyncadd [#allocation4], 4294967040 }
 0x238   :  { %673 = dma.done.wait [#allocation10], 128  }
 0x239   :  { %674 = vsyncadd [#allocation10], 4294967168 }
 0x23a   :  { %438 = vsyncpa [#allocation3], 1 }
 0x23b   :  { %439 = vsyncpa [#allocation6], 1 }
 0x23c   :  { %440 = vsyncpa [#allocation4], 1 }
 0x23d   :  { %441 = vsyncpa [#allocation10], 1 }

// kernel: tpu_custom_call.1
= control target key start
LH: loop header
LB: loop body
LE: loop exit
PB: predicated region body
PF: predicated region fallthrough
CT: control target
= control target key end

     0   :  { %12 = vsyncpa [#allocation3], 0  ;;  %s786_s0 = inlined_call_operand.hbm [shape: bf16[8,256], index: 0, kind: input, shape index: {}]   ;;  %s787_s1 = inlined_call_operand.hbm [shape: bf16[256,128], index: 1, kind: input, shape index: {}]   ;;  %s788_s2 = inlined_call_operand.hbm [shape: bf16[128,256], index: 2, kind: input, shape index: {}]   ;;  %s789_s3 = inlined_call_operand.vmem [shape: f32[1,128], index: 3, kind: input, shape index: {}]   ;;  %s790_s4 = inlined_call_operand.vmem [shape: f32[1,256], index: 4, kind: input, shape index: {}]   ;;  %s791_s5 = inlined_call_operand.hbm [shape: f32[8,256], index: 5, kind: output, shape index: {0}]   ;;  %s792_s6 = inlined_call_operand.hbm [shape: f32[8,128], index: 6, kind: output, shape index: {1}]  }
   0x1   :  { %13 = vsyncpa [#allocation6], 0 }
   0x2   :  { %14 = vsyncpa [#allocation4], 0 }
   0x3   :  { %15 = vsyncpa [#allocation10], 0  ;;  %s675_s21 = smov [#allocation5]   ;;  %s557_s25 = scalar_lea.hbm %s787_s1, 2048 }
   0x4   :  { %s31_s22 = sshll.u32 %s675_s21, 4  ;;  %p558_p0 = scmp.ne.s32.totalorder %s787_s1, %s557_s25  ;;  %s32_s22 = int_to_ptr.vmem [resolvable:$true] %s31_s22 }
   0x5   :  { %p561_p1 = scmp.lt.u32.totalorder %s557_s25, %s787_s1 }
   0x7   :  { %p563_p2 = pnand %p561_p1, %p558_p0 }
   0x9   :  { %566 = shalt.err (!%p563_p2)
}
   0xa   :  { %s567_s30 = scalar_lea.vmem %s32_s22, 2048  ;;  %p572_p4 = scmp.lt.s32.totalorder %s32_s22, %s32_s22 }
   0xb   :  { %p568_p3 = scmp.ne.s32.totalorder %s32_s22, %s567_s30  ;;  %p573_p5 = scmp.lt.s32.totalorder %s567_s30, %s567_s30 }
   0xd   :  { %p574_p6 = por %p573_p5, %p572_p4 }
   0xf   :  { %p575_p7 = pnand %p574_p6, %p568_p3 }
  0x11   :  { %578 = shalt.err (!%p575_p7)
}
  0x12   :  { %s676_s7 = smov 64   ;;  %s677_s8 = smov 4  }
  0x13   :  { %37 = dma.hbm_to_vmem [thread:$0]  %s787_s1, 2048, %s32_s22, [#allocation6], %s676_s7, %s676_s7, %s677_s8  }
  0x14   :  { %s678_s11 = smov [#allocation2]   ;;  %s679_s13 = smov [#allocation7]  }
  0x15   :  { %s22_s12 = sshll.u32 %s678_s11, 4  ;;  %s43_s14 = sshll.u32 %s679_s13, 4  ;;  %s23_s12 = int_to_ptr.vmem [resolvable:$true] %s22_s12  ;;  %s44_s14 = int_to_ptr.vmem [resolvable:$true] %s43_s14 }
  0x16   :  { %s579_s17 = scalar_lea.hbm %s786_s0, 128 }
  0x17   :  { %p580_p8 = scmp.ne.s32.totalorder %s786_s0, %s579_s17  ;;  %p583_p9 = scmp.lt.u32.totalorder %s579_s17, %s786_s0 }
  0x19   :  { %p585_p10 = pnand %p583_p9, %p580_p8 }
  0x1b   :  { %588 = shalt.err (!%p585_p10)
}
  0x1c   :  { %s589_s1 = scalar_lea.vmem %s23_s12, 128  ;;  %p594_p12 = scmp.lt.s32.totalorder %s23_s12, %s23_s12 }
  0x1d   :  { %p590_p11 = scmp.ne.s32.totalorder %s23_s12, %s589_s1  ;;  %p595_p13 = scmp.lt.s32.totalorder %s589_s1, %s589_s1 }
  0x1f   :  { %p596_p0 = por %p595_p13, %p594_p12 }
  0x21   :  { %p597_p1 = pnand %p596_p0, %p590_p11 }
  0x23   :  { %600 = shalt.err (!%p597_p1)
}
  0x24   :  { %25 = dma.hbm_to_vmem [thread:$0]  %s786_s0, 128, %s23_s12, [#allocation3]  }
  0x25   :  { %s601_s26 = scalar_lea.hbm %s788_s2, 2048 }
  0x26   :  { %p602_p2 = scmp.ne.s32.totalorder %s788_s2, %s601_s26  ;;  %p605_p3 = scmp.lt.u32.totalorder %s601_s26, %s788_s2 }
  0x28   :  { %p607_p4 = pnand %p605_p3, %p602_p2 }
  0x2a   :  { %610 = shalt.err (!%p607_p4)
}
  0x2b   :  { %s611_s7 = scalar_lea.vmem %s44_s14, 2048  ;;  %p616_p6 = scmp.lt.s32.totalorder %s44_s14, %s44_s14 }
  0x2c   :  { %p612_p5 = scmp.ne.s32.totalorder %s44_s14, %s611_s7  ;;  %p617_p7 = scmp.lt.s32.totalorder %s611_s7, %s611_s7 }
  0x2e   :  { %p618_p8 = por %p617_p7, %p616_p6 }
  0x30   :  { %p619_p9 = pnand %p618_p8, %p612_p5 }
  0x32   :  { %622 = shalt.err (!%p619_p9)
}
  0x33   :  { %s680_s0 = smov 128   ;;  %s681_s8 = smov 8  }
  0x34   :  { %49 = dma.hbm_to_vmem [thread:$0]  %s788_s2, 2048, %s44_s14, [#allocation6], %s680_s0, %s680_s0, %s681_s8  }
  0x35   :  { %667 = dma.done.wait [#allocation3], 128  }
  0x36   :  { %668 = vsyncadd [#allocation3], 4294967168 }
  0x37   :  { %669 = dma.done.wait [#allocation6], 4096  }
  0x38   :  { %670 = vsyncadd [#allocation6], 4294963200  ;;  %v509_v0 = vld [vmem:[#allocation5 + $0x40] sm:$0xff]   ;;  %v511_v2 = vld [vmem:[#allocation5 + $0x48] sm:$0xff]   ;;  %v682_v35 = vmov 0   ;;  %s683_s12 = smov [#allocation9]  }
  0x39   :  { %v510_v1 = vld [vmem:[#allocation5] sm:$0xff]   ;;  %477 = vmatprep.subr.bf16.mxu0 %v509_v0  ;;  %v512_v3 = vld [vmem:[#allocation5 + $0x8] sm:$0xff]   ;;  %v513_v4 = vld [vmem:[#allocation5 + $0x50] sm:$0xff]   ;;  %392 = vmatprep.mubr.bf16.mxu1 %v682_v35  ;;  %s428_s13 = sshll.u32 %s683_s12, 4  ;;  %s429_s13 = int_to_ptr.vmem [resolvable:$true] %s428_s13 }
  0x3a   :  { %478 = vmatpush3.bf16.msra.mxu0 %v510_v1  ;;  %v514_v5 = vld [vmem:[#allocation5 + $0x10] sm:$0xff]   ;;  %v515_v6 = vld [vmem:[#allocation5 + $0x58] sm:$0xff]   ;;  %v517_v8 = vld [vmem:[#allocation5 + $0x60] sm:$0xff]   ;;  %s623_s14 = scalar_lea.vmem %s429_s13, 128  ;;  %p628_p11 = scmp.lt.s32.totalorder %s429_s13, %s429_s13 }
  0x3b   :  { %479 = vmatprep.subr.bf16.mxu0 %v511_v2  ;;  %v516_v7 = vld [vmem:[#allocation5 + $0x18] sm:$0xff]   ;;  %v518_v9 = vld [vmem:[#allocation5 + $0x20] sm:$0xff]   ;;  %v519_v10 = vld [vmem:[#allocation5 + $0x68] sm:$0xff]   ;;  %p624_p10 = scmp.ne.s32.totalorder %s429_s13, %s623_s14  ;;  %p629_p12 = scmp.lt.s32.totalorder %s623_s14, %s623_s14 }
  0x3c   :  { %v64_v11 = vld [vmem:[#allocation2] sm:$0xff]  ;;  %v520_v12 = vld [vmem:[#allocation5 + $0x28] sm:$0xff]   ;;  %v521_v16 = vld [vmem:[#allocation5 + $0x70] sm:$0xff]  }
  0x3d   :  { %v444_v13 = vcombine.high %v64_v11, %v64_v11  ;;  %v527_v14 = vld [vmem:[#allocation7 + $0x4] ss:$8 sps:$4 sm:$0xff]   ;;  %v529_v15 = vld [vmem:[#allocation7] ss:$8 sps:$4 sm:$0xff]   ;;  %v530_v17 = vld [vmem:[#allocation7 + $0x14] ss:$8 sps:$4 sm:$0xff]   ;;  %v443_v22 = vcombine.low %v64_v11, %v64_v11  ;;  %p630_p13 = por %p629_p12, %p628_p11 }
  0x3e   :  { %480 = vmatpush3.bf16.msra.mxu0 %v512_v3  ;;  %v532_v18 = vld [vmem:[#allocation7 + $0x10] ss:$8 sps:$4 sm:$0xff]   ;;  %360 = vmatprep.subr.bf16.mxu1 %v527_v14  ;;  %v533_v23 = vld [vmem:[#allocation7 + $0x24] ss:$8 sps:$4 sm:$0xff]   ;;  %v535_v24 = vld [vmem:[#allocation7 + $0x20] ss:$8 sps:$4 sm:$0xff]  }
  0x3f   :  { %481 = vmatprep.subr.bf16.mxu0 %v513_v4  ;;  %256 = vmatprep.mubr.bf16.mxu0 %v444_v13  ;;  %v522_v19 = vld [vmem:[#allocation5 + $0x30] sm:$0xff]   ;;  %v523_v20 = vld [vmem:[#allocation5 + $0x78] sm:$0xff]   ;;  %v539_v27 = vld [vmem:[#allocation7 + $0x44] ss:$8 sps:$4 sm:$0xff]   ;;  %p631_p0 = pnand %p630_p13, %p624_p10 }
  0x40   :  { %361 = vmatpush1.bf16.msra.mxu1 %v529_v15  ;;  %v524_v21 = vld [vmem:[#allocation5 + $0x38] sm:$0xff]   ;;  %v541_v28 = vld [vmem:[#allocation7 + $0x40] ss:$8 sps:$4 sm:$0xff]   ;;  %v545_v31 = vld [vmem:[#allocation7 + $0x64] ss:$8 sps:$4 sm:$0xff]  }
  0x41   :  { %362 = vmatprep.subr.bf16.mxu1 %v530_v17  ;;  %v536_v25 = vld [vmem:[#allocation7 + $0x34] ss:$8 sps:$4 sm:$0xff]   ;;  %v538_v26 = vld [vmem:[#allocation7 + $0x30] ss:$8 sps:$4 sm:$0xff]   ;;  %v547_v32 = vld [vmem:[#allocation7 + $0x60] ss:$8 sps:$4 sm:$0xff]  }
  0x42   :  { %482 = vmatpush3.bf16.msra.mxu0 %v514_v5  ;;  %v542_v29 = vld [vmem:[#allocation7 + $0x54] ss:$8 sps:$4 sm:$0xff]   ;;  %v544_v30 = vld [vmem:[#allocation7 + $0x50] ss:$8 sps:$4 sm:$0xff]  }
  0x43   :  { %483 = vmatprep.subr.bf16.mxu0 %v515_v6  ;;  %v548_v33 = vld [vmem:[#allocation7 + $0x74] ss:$8 sps:$4 sm:$0xff]   ;;  %v550_v34 = vld [vmem:[#allocation7 + $0x70] ss:$8 sps:$4 sm:$0xff]  }
  0x44   :  { %363 = vmatpush1.bf16.msra.mxu1 %v532_v18  ;;  %v442_v37 = vld [vmem:[%s789_s3] ss:$0 sm:$0xff] }
  0x45   :  { %364 = vmatprep.subr.bf16.mxu1 %v533_v23 }
  0x46   :  { %484 = vmatpush3.bf16.msra.mxu0 %v516_v7 }
  0x47   :  { %485 = vmatprep.subr.bf16.mxu0 %v517_v8 }
  0x48   :  { %365 = vmatpush1.bf16.msra.mxu1 %v535_v24 }
  0x49   :  { %366 = vmatprep.subr.bf16.mxu1 %v536_v25 }
  0x4a   :  { %486 = vmatpush3.bf16.msra.mxu0 %v518_v9 }
  0x4b   :  { %487 = vmatprep.subr.bf16.mxu0 %v519_v10 }
  0x4c   :  { %367 = vmatpush1.bf16.msra.mxu1 %v538_v26 }
  0x4d   :  { %368 = vmatprep.subr.bf16.mxu1 %v539_v27 }
  0x4e   :  { %488 = vmatpush3.bf16.msra.mxu0 %v520_v12 }
  0x4f   :  { %489 = vmatprep.subr.bf16.mxu0 %v521_v16 }
  0x50   :  { %369 = vmatpush1.bf16.msra.mxu1 %v541_v28 }
  0x51   :  { %370 = vmatprep.subr.bf16.mxu1 %v542_v29 }
  0x52   :  { %490 = vmatpush3.bf16.msra.mxu0 %v522_v19 }
  0x53   :  { %491 = vmatprep.subr.bf16.mxu0 %v523_v20 }
  0x54   :  { %371 = vmatpush1.bf16.msra.mxu1 %v544_v30 }
  0x55   :  { %372 = vmatprep.subr.bf16.mxu1 %v545_v31 }
  0x56   :  { %492 = vmatpush3.bf16.msra.mxu0 %v524_v21 }
  0x58   :  { %373 = vmatpush1.bf16.msra.mxu1 %v547_v32 }
  0x59   :  { %257 = vmatmul.mubr.bf16.vlgmr.msra.gmra.mrb[0].mxu0 %v443_v22  ;;  %374 = vmatprep.subr.bf16.mxu1 %v548_v33 }
  0x5c   :  { %375 = vmatpush1.bf16.msra.mxu1 %v550_v34 }
 0x12c   :  { %v493_v36 = vpop.f32.mrb[0].mxu0 }
 0x12d   :  { %v494_v38 = vpop.f32.mrb[1].mxu0 }
 0x12e   :  { %v495_v39 = vadd.f32 %v494_v38, %v493_v36  ;;  %v496_v40 = vpop.f32.mrb[2].mxu0 }
 0x12f   :  { %v497_v41 = vpop.f32.mrb[3].mxu0 }
 0x130   :  { %v259_v42 = vadd.f32 %v495_v39, %v442_v37 }
 0x132   :  { %v264_v43 = vmul.f32 0.5, %v259_v42 }
 0x134   :  { %551 = vtanh.f32 %v264_v43 }
 0x13e   :  { %v552_v44 = vpop.eup %551 }
 0x13f   :  { %v266_v45 = vmul.f32 0.5, %v552_v44 }
 0x141   :  { %v267_v46 = vadd.f32 0.5, %v266_v45 }
 0x143   :  { %v268_v47 = vpack.c.bf16 %v267_v46, %v267_v46  ;;  %409 = vst [vmem:[#allocation9] sm:$0xff] %v267_v46 }
 0x145   :  { %393 = vmatmul.mubr.bf16.vlgmr.msra.gmra.mrb[0].mxu1 %v268_v47 }
 0x146   :  { %634 = shalt.err (!%p631_p0)
}
 0x147   :  { %s635_s16 = scalar_lea.hbm %s792_s6, 128 }
 0x148   :  { %p636_p1 = scmp.ne.s32.totalorder %s792_s6, %s635_s16  ;;  %p639_p2 = scmp.lt.u32.totalorder %s635_s16, %s792_s6 }
 0x14a   :  { %p641_p3 = pnand %p639_p2, %p636_p1 }
 0x14c   :  { %644 = shalt.err (!%p641_p3)
}
 0x14d   :  { %431 = dma.vmem_to_hbm [thread:$0]  %s429_s13, 128, %s792_s6, [#allocation10]   ;;  %v270_v48 = vlaneseq  ;;  %v114_v51 = vld [vmem:[%s790_s4] sm:$0x3] }
 0x14e   :  { %s684_s6 = smov [#allocation8]  }
 0x14f   :  { %v271_v49 = vshrl.u32 %v270_v48, 7  ;;  %s418_s24 = sshll.u32 %s684_s6, 4  ;;  %s419_s24 = int_to_ptr.vmem [resolvable:$true] %s418_s24 }
 0x150   :  { %s645_s4 = scalar_lea.vmem %s419_s24, 256  ;;  %p650_p5 = scmp.lt.s32.totalorder %s419_s24, %s419_s24 }
 0x151   :  { %v272_v50 = vsub.s32 0, %v271_v49  ;;  %v276_v52 = vsub.s32 1, %v271_v49  ;;  %p646_p4 = scmp.ne.s32.totalorder %s419_s24, %s645_s4  ;;  %p651_p6 = scmp.lt.s32.totalorder %s645_s4, %s645_s4 }
 0x153   :  { %v273_v53 = vrot.slane %v114_v51, %v272_v50  ;;  %v277_v54 = vrot.slane %v114_v51, %v276_v52  ;;  %p652_p7 = por %p651_p6, %p650_p5 }
 0x155   :  { %p653_p8 = pnand %p652_p7, %p646_p4 }
 0x218   :  { %v394_v55 = vpop.f32.mrb[0].mxu1 }
 0x219   :  { %v395_v56 = vadd.f32 %v394_v55, %v273_v53  ;;  %v396_v57 = vpop.f32.mrb[1].mxu1 }
 0x21a   :  { %v397_v58 = vadd.f32 %v396_v57, %v277_v54  ;;  %v398_v59 = vpop.f32.mrb[2].mxu1 }
 0x21b   :  { %v401_v60 = vmul.f32 0.5, %v395_v56  ;;  %v399_v61 = vpop.f32.mrb[3].mxu1 }
 0x21c   :  { %v402_v62 = vmul.f32 0.5, %v397_v58 }
 0x21d   :  { %553 = vtanh.f32 %v401_v60 }
 0x21e   :  { %555 = vtanh.f32 %v402_v62 }
 0x227   :  { %v554_v63 = vpop.eup %553 }
 0x228   :  { %v556_v0 = vpop.eup %555  ;;  %v405_v1 = vmul.f32 0.5, %v554_v63 }
 0x229   :  { %v406_v2 = vmul.f32 0.5, %v556_v0 }
 0x22a   :  { %v407_v3 = vadd.f32 0.5, %v405_v1 }
 0x22b   :  { %v408_v4 = vadd.f32 0.5, %v406_v2 }
 0x22c   :  { %410 = vst [vmem:[#allocation8] sm:$0xff] %v407_v3 }
 0x22d   :  { %411 = vst [vmem:[#allocation8 + $0x8] sm:$0xff] %v408_v4 }
 0x22e   :  { %656 = shalt.err (!%p653_p8)
}
 0x22f   :  { %s657_s27 = scalar_lea.hbm %s791_s5, 256 }
 0x230   :  { %p658_p9 = scmp.ne.s32.totalorder %s791_s5, %s657_s27  ;;  %p661_p10 = scmp.lt.u32.totalorder %s657_s27, %s791_s5 }
 0x232   :  { %p663_p11 = pnand %p661_p10, %p658_p9 }
 0x234   :  { %666 = shalt.err (!%p663_p11)
}
 0x235   :  { %421 = dma.vmem_to_hbm [thread:$0]  %s419_s24, 256, %s791_s5, [#allocation4]  }
 0x236   :  { %671 = dma.done.wait [#allocation4], 256  }
 0x237   :  { %672 = vsyncadd [#allocation4], 4294967040 }
 0x238   :  { %673 = dma.done.wait [#allocation10], 128  }
 0x239   :  { %674 = vsyncadd [#allocation10], 4294967168 }
 0x23a   :  { %438 = vsyncpa [#allocation3], 1 }
 0x23b   :  { %439 = vsyncpa [#allocation6], 1 }
 0x23c   :  { %440 = vsyncpa [#allocation4], 1 }
 0x23d   :  { %441 = vsyncpa [#allocation10], 1 }

</bundles_post_ra>
